<compile_context>
chip_gen: v6e
topology: v6e:2x2x1
jax: 0.10.0
libtpu: 0.0.40
codegen_flags: <defaults>
</compile_context>

<pallas_src>
import functools

import numpy as np
import jax
import jax.numpy as jnp
from jax.experimental import pallas as pl
from jax.experimental.pallas import tpu as pltpu


_LANE = 128
_SUBLANE = 8
_TARGET_OUT_BYTES_PER_STEP = 4 * 1024 * 1024   # aim for >= ~4 MiB of output per grid step
_VMEM_BLOCK_BUDGET = 20 * 1024 * 1024          # double-buffered blocks + matmul temps
_VMEM_LIMIT_BYTES = 40 * 1024 * 1024           # explicit scoped-VMEM limit: above v5e's
                                               # 16 MiB default, well under v7x's 64 MiB
_MAX_TILE_N = 32 * 1024


def _round_up(n, m):
    return ((n + m - 1) // m) * m


def _round_down(n, m):
    return (n // m) * m


def _pick_tile_n(n, k, out_itemsize, requested):
    """K-aware N-tile: large enough to amortize per-step pipeline overhead,
    small enough that double-buffered blocks (+ f32 temporaries) fit VMEM."""
    if n <= _LANE:
        return n                                   # single block; block dims == array dims
    k_lanes = _round_up(k, _LANE)                  # narrow outputs are lane-padded in VMEM
    # Per output row: 2x (2,T) x buffers (8-sublane padded) + 2x (T,K) out buffers
    # + ~2x (T,K) f32 temporaries (matmul result / bias add).
    bytes_per_row = (2 * _SUBLANE * 4
                     + 2 * k_lanes * max(out_itemsize, 4)
                     + 2 * k_lanes * 4)
    vmem_rows = _VMEM_BLOCK_BUDGET // bytes_per_row
    want_rows = _TARGET_OUT_BYTES_PER_STEP // max(1, k * out_itemsize)
    if requested is not None:
        want_rows = requested                      # caller override (still clamped below)
    rows = min(want_rows, vmem_rows, _MAX_TILE_N, n)
    rows = max(_LANE, _round_down(rows, _LANE))    # always a multiple of 128
    return min(rows, _round_down(n, _LANE))


def _linear_kernel(x_ref, wt_ref, b_ref, o_ref):
    # x_ref : (2, T)  batch on the 128-lane axis (lane-dense streaming reads)
    # wt_ref: (2, K)  resident weight, pre-transposed to (in_features, out_features)
    # b_ref : (1, K)  resident bias
    # o_ref : (T, K)  final nn.Linear output layout (row = input point)
    #
    # out[t, k] = sum_c x[c, t] * wt[c, k] + b[k]
    # The depth-2 contraction runs on the otherwise-idle MXU; it also performs
    # the lane<->sublane relayout from the lane-dense x stream into the (T, K)
    # output block, so no post-kernel transpose pass over (N, K) is needed.
    out = jax.lax.dot_general(
        x_ref[...], wt_ref[...],
        dimension_numbers=(((0,), (0,)), ((), ())),   # contract the feature dim (size 2)
        preferred_element_type=jnp.float32,
    )
    o_ref[...] = (out + b_ref[...]).astype(o_ref.dtype)


@functools.partial(jax.jit, static_argnames=("tile_n", "out_dtype", "x_is_lane_major"))
def inet_forward(x, w, b, *, tile_n=None, out_dtype=jnp.float32, x_is_lane_major=False):
    """Pallas forward for iNet (nn.Linear(2, k)).

    x : (N, 2) float  -- or (2, N) if x_is_lane_major=True (skips the x transpose pass)
    w : (K, 2) float  (PyTorch nn.Linear weight layout)
    b : (K,)   float
    returns (N, K) in out_dtype (f32 math in-kernel; bf16 = cast-on-store).
    """
    if x_is_lane_major:
        x_t = x.astype(jnp.float32)            # already (2, N)
    else:
        x_t = x.astype(jnp.float32).T          # (N, 2) -> (2, N): lane-dense reads
    _, n = x_t.shape
    k = w.shape[0]
    out_itemsize = int(np.dtype(out_dtype).itemsize)

    tn = _pick_tile_n(n, k, out_itemsize, tile_n)
    num_tiles = pl.cdiv(n, tn)                 # ragged tails: boundary blocks are masked;
                                               # out rows >= N are never written.

    wt = w.astype(jnp.float32).T               # (2, K): resident, MXU-ready orientation
    b2 = b.astype(jnp.float32).reshape(1, k)   # (1, K): resident

    cost = pl.CostEstimate(
        flops=4 * n * k,
        transcendentals=0,
        bytes_accessed=4 * 2 * n + 4 * 2 * k + 4 * k + out_itemsize * n * k,
    )

    return pl.pallas_call(
        _linear_kernel,
        out_shape=jax.ShapeDtypeStruct((n, k), out_dtype),
        grid=(num_tiles,),
        in_specs=[
            pl.BlockSpec((2, tn), lambda i: (0, i)),    # x: tiled + double-buffered
            pl.BlockSpec((2, k), lambda i: (0, 0)),     # weight: resident (single DMA)
            pl.BlockSpec((1, k), lambda i: (0, 0)),     # bias: resident (single DMA)
        ],
        out_specs=pl.BlockSpec((tn, k), lambda i: (i, 0)),  # final (N, K) layout, no epilogue
        compiler_params=pltpu.CompilerParams(
            # TODO(synk): on v7x switch this axis to pltpu.CORE_PARALLEL (plain PARALLEL
            # may not actually shard across the two TensorCores); kept portable here.
            dimension_semantics=(pltpu.PARALLEL,),
            vmem_limit_bytes=_VMEM_LIMIT_BYTES,
        ),
        cost_estimate=cost,
    )(x_t, wt, b2)


if __name__ == "__main__":
    key = jax.random.PRNGKey(0)
    k_dim = 32          # `k` argument of iNet.__init__
    n_pts = 256         # small batch of 2-D points

    kx, kw, kb = jax.random.split(key, 3)

    # Deterministic parameter init matching nn.Linear(2, k) fan-in bounds.
    bound = 1.0 / jnp.sqrt(2.0)
    w = jax.random.uniform(kw, (k_dim, 2), jnp.float32, -bound, bound)   # (K, 2)
    b = jax.random.uniform(kb, (k_dim,), jnp.float32, -bound, bound)
    x = jax.random.normal(kx, (n_pts, 2), jnp.float32)

    ref = x @ w.T + b

    # Tolerance note: the contraction runs on the MXU; depending on generation /
    # default matmul precision the per-element error can be bf16-grade (~1e-2 abs
    # for O(1) inputs), so the checks use a correspondingly loose tolerance.
    out = jax.block_until_ready(inet_forward(x, w, b))
    assert out.shape == (n_pts, k_dim) and out.dtype == jnp.float32
    assert jnp.allclose(out, ref, rtol=2e-2, atol=2e-2), "f32 mismatch vs reference"

    # Multi-tile grid path (tile_n forced to a 128 multiple, 2 grid steps).
    out_tiled = jax.block_until_ready(inet_forward(x, w, b, tile_n=128))
    assert jnp.allclose(out_tiled, ref, rtol=2e-2, atol=2e-2), "tiled mismatch vs reference"

    # Optional bf16-output fast path: halves the dominant HBM write traffic.
    out_bf16 = jax.block_until_ready(inet_forward(x, w, b, out_dtype=jnp.bfloat16))
    assert out_bf16.dtype == jnp.bfloat16
    assert jnp.allclose(out_bf16.astype(jnp.float32), ref, rtol=3e-2, atol=3e-2), \
        "bf16 mismatch vs reference"

    print("KERNEL_OK")
</pallas_src>

<mosaic_0001>
module attributes {stable_mosaic.version = 11 : i64} {
  func.func @_linear_kernel(%arg0: i32, %arg1: memref<2x256xf32, #tpu.memory_space<vmem>>, %arg2: memref<2x32xf32, #tpu.memory_space<vmem>>, %arg3: memref<1x32xf32, #tpu.memory_space<vmem>>, %arg4: memref<256x32xf32, #tpu.memory_space<vmem>>) attributes {dimension_semantics = [#tpu.dimension_semantics<parallel>], iteration_bounds = array<i64: 1>, scalar_prefetch = 0 : i64, scratch_operands = 0 : i64, tpu.core_type = #tpu.core_type<tc>, window_params = [{transform_indices = @transform_0, window_bounds = array<i64: 2, 256>}, {pipeline_mode = #tpu.pipeline_mode<synchronous>, transform_indices = @transform_1, window_bounds = array<i64: 2, 32>}, {pipeline_mode = #tpu.pipeline_mode<synchronous>, transform_indices = @transform_2, window_bounds = array<i64: 1, 32>}, {transform_indices = @transform_3, window_bounds = array<i64: 256, 32>}]} {
    %c0 = arith.constant 0 : index
    %c0_0 = arith.constant 0 : index
    %0 = vector.load %arg1[%c0, %c0_0] : memref<2x256xf32, #tpu.memory_space<vmem>>, vector<2x256xf32>
    %c0_1 = arith.constant 0 : index
    %c0_2 = arith.constant 0 : index
    %1 = vector.load %arg2[%c0_1, %c0_2] : memref<2x32xf32, #tpu.memory_space<vmem>>, vector<2x32xf32>
    %cst = arith.constant dense<0.000000e+00> : vector<256x32xf32>
    %2 = tpu.matmul %0, %1, %cst {dimension_numbers = #tpu.dot_dimension_numbers<[0], [0], [1], [1], [0, 1, 1, 1], [], []>} : vector<2x256xf32>, vector<2x32xf32>, vector<256x32xf32> -> vector<256x32xf32>
    %c0_3 = arith.constant 0 : index
    %c0_4 = arith.constant 0 : index
    %3 = vector.load %arg3[%c0_3, %c0_4] : memref<1x32xf32, #tpu.memory_space<vmem>>, vector<1x32xf32>
    %4 = vector.broadcast %3 : vector<1x32xf32> to vector<256x32xf32>
    %5 = arith.addf %2, %4 : vector<256x32xf32>
    %c0_5 = arith.constant 0 : index
    %c0_6 = arith.constant 0 : index
    %6 = vector.load %arg4[%c0_5, %c0_6] : memref<256x32xf32, #tpu.memory_space<vmem>>, vector<256x32xf32>
    tpu.vector_store %arg4[%c0_5, %c0_6], %5 {strides = array<i32>} : memref<256x32xf32, #tpu.memory_space<vmem>>, vector<256x32xf32>,
    return
  }
  func.func @transform_0(%arg0: i32) -> (i32, i32) {
    %c0_i32 = arith.constant 0 : i32
    %c0_i32_0 = arith.constant 0 : i32
    return %c0_i32, %arg0 : i32, i32
  }
  func.func @transform_1(%arg0: i32) -> (i32, i32) {
    %c0_i32 = arith.constant 0 : i32
    %c0_i32_0 = arith.constant 0 : i32
    %c0_i32_1 = arith.constant 0 : i32
    return %c0_i32, %c0_i32_0 : i32, i32
  }
  func.func @transform_2(%arg0: i32) -> (i32, i32) {
    %c0_i32 = arith.constant 0 : i32
    %c0_i32_0 = arith.constant 0 : i32
    %c0_i32_1 = arith.constant 0 : i32
    return %c0_i32, %c0_i32_0 : i32, i32
  }
  func.func @transform_3(%arg0: i32) -> (i32, i32) {
    %c0_i32 = arith.constant 0 : i32
    %c0_i32_0 = arith.constant 0 : i32
    return %arg0, %c0_i32 : i32, i32
  }
}

</mosaic_0001>

<bundles_post_ra>
// kernel: inet_forward.1
= control target key start
LH: loop header
LB: loop body
LE: loop exit
PB: predicated region body
PF: predicated region fallthrough
CT: control target
= control target key end

     0   :  { %vm195_vm0 = vcmask 1041408   ;;  %vm98_vm1 = vcmask 15360   ;;  %vm424_vm2 = vcmask 261120   ;;  %s805_s0 = inlined_call_operand.vmem [shape: f32[2,256], index: 0, kind: input, shape index: {}]   ;;  %s806_s1 = inlined_call_operand.vmem [shape: f32[2,32], index: 1, kind: input, shape index: {}]   ;;  %s807_s2 = inlined_call_operand.vmem [shape: f32[1,32], index: 2, kind: input, shape index: {}]   ;;  %s808_s3 = inlined_call_operand.vmem [shape: f32[256,32], index: 3, kind: output, shape index: {}]  }
   0x1   :  { %v462_v0 = vld.sshfl [vmem:[%s805_s0] sm:$0x33 pattern:$0x76325410] }
   0x2   :  { %v15_v1 = vld [vmem:[%s806_s1] sm:$0x3]  ;;  %34 = vxpose.xlu0.b32.start.end [1/1] (short) %v462_v0, 128  ;;  %v31_v2 = vcombine.high %v462_v0, %v462_v0 }
   0x3   :  { %529 = vmatprep.subr.msk.mxu0 %vm195_vm0, %v15_v1  ;;  %579 = vmatprep.subr.msk.mxu1 %vm195_vm0, %v15_v1  ;;  %v643_v35 = vld [vmem:[%s807_s2] ss:$0 sm:$0xff] }
   0x4   :  { %530 = vmatpush3.msk.msra.mxu0 %vm195_vm0, %v15_v1  ;;  %580 = vmatpush3.msk.msra.mxu1 %vm195_vm0, %v15_v1 }
  0x3f   :  { %66 = vxpose.xlu0.b32.start.end [1/1] (short) %v31_v2, 128 }
  0x7e   :  { %v50_v3 = vpop.trf.xlu0 }
  0x7f   :  { %531 = vmatprep.mubr.msk.f32.mxu0 %vm98_vm1, %v50_v3 }
  0x82   :  { %v51_v4 = vpop.trf.xlu0 }
  0x83   :  { %532 = vmatmul.mubr.msk.f32.vlgmr.msra.gmra.mxu0 %vm98_vm1, %v51_v4 }
  0x86   :  { %v52_v5 = vpop.trf.xlu0 }
  0x87   :  { %534 = vmatprep.mubr.msk.f32.mxu0 %vm98_vm1, %v52_v5 }
  0x8a   :  { %v53_v6 = vpop.trf.xlu0 }
  0x8b   :  { %535 = vmatmul.mubr.msk.f32.gmra.mxu0 %vm98_vm1, %v53_v6 }
  0x8e   :  { %v54_v7 = vpop.trf.xlu0 }
  0x8f   :  { %537 = vmatprep.mubr.msk.f32.mxu0 %vm98_vm1, %v54_v7 }
  0x92   :  { %v55_v8 = vpop.trf.xlu0 }
  0x93   :  { %538 = vmatmul.mubr.msk.f32.gmra.mxu0 %vm98_vm1, %v55_v8 }
  0x96   :  { %v56_v9 = vpop.trf.xlu0 }
  0x97   :  { %540 = vmatprep.mubr.msk.f32.mxu0 %vm98_vm1, %v56_v9 }
  0x9a   :  { %v57_v10 = vpop.trf.xlu0 }
  0x9b   :  { %541 = vmatmul.mubr.msk.f32.gmra.mxu0 %vm98_vm1, %v57_v10 }
  0x9e   :  { %v58_v11 = vpop.trf.xlu0 }
  0x9f   :  { %543 = vmatprep.mubr.msk.f32.mxu0 %vm98_vm1, %v58_v11 }
  0xa2   :  { %v59_v12 = vpop.trf.xlu0 }
  0xa3   :  { %544 = vmatmul.mubr.msk.f32.gmra.mxu0 %vm98_vm1, %v59_v12 }
  0xa6   :  { %v60_v13 = vpop.trf.xlu0 }
  0xa7   :  { %546 = vmatprep.mubr.msk.f32.mxu0 %vm98_vm1, %v60_v13 }
  0xaa   :  { %v61_v14 = vpop.trf.xlu0 }
  0xab   :  { %547 = vmatmul.mubr.msk.f32.gmra.mxu0 %vm98_vm1, %v61_v14 }
  0xae   :  { %v62_v15 = vpop.trf.xlu0 }
  0xaf   :  { %549 = vmatprep.mubr.msk.f32.mxu0 %vm98_vm1, %v62_v15 }
  0xb2   :  { %v63_v16 = vpop.trf.xlu0 }
  0xb3   :  { %550 = vmatmul.mubr.msk.f32.gmra.mxu0 %vm98_vm1, %v63_v16 }
  0xb6   :  { %v64_v17 = vpop.trf.xlu0 }
  0xb7   :  { %552 = vmatprep.mubr.msk.f32.mxu0 %vm98_vm1, %v64_v17 }
  0xba   :  { %v65_v18 = vpop.trf.xlu0 }
  0xbb   :  { %553 = vmatmul.mubr.msk.f32.gmra.mxu0 %vm98_vm1, %v65_v18 }
  0xbe   :  { %v82_v19 = vpop.trf.xlu0 }
  0xbf   :  { %555 = vmatprep.mubr.msk.f32.mxu1 %vm98_vm1, %v82_v19 }
  0xc2   :  { %v83_v20 = vpop.trf.xlu0 }
  0xc3   :  { %556 = vmatmul.mubr.msk.f32.vlgmr.msra.gmra.mxu1 %vm98_vm1, %v83_v20 }
  0xc6   :  { %v84_v21 = vpop.trf.xlu0 }
  0xc7   :  { %558 = vmatprep.mubr.msk.f32.mxu1 %vm98_vm1, %v84_v21 }
  0xca   :  { %v85_v22 = vpop.trf.xlu0 }
  0xcb   :  { %559 = vmatmul.mubr.msk.f32.gmra.mxu1 %vm98_vm1, %v85_v22 }
  0xce   :  { %v86_v23 = vpop.trf.xlu0 }
  0xcf   :  { %561 = vmatprep.mubr.msk.f32.mxu1 %vm98_vm1, %v86_v23 }
  0xd2   :  { %v87_v24 = vpop.trf.xlu0 }
  0xd3   :  { %562 = vmatmul.mubr.msk.f32.gmra.mxu1 %vm98_vm1, %v87_v24 }
  0xd6   :  { %v88_v25 = vpop.trf.xlu0 }
  0xd7   :  { %564 = vmatprep.mubr.msk.f32.mxu1 %vm98_vm1, %v88_v25 }
  0xda   :  { %v89_v26 = vpop.trf.xlu0 }
  0xdb   :  { %565 = vmatmul.mubr.msk.f32.gmra.mxu1 %vm98_vm1, %v89_v26 }
  0xde   :  { %v90_v27 = vpop.trf.xlu0 }
  0xdf   :  { %567 = vmatprep.mubr.msk.f32.mxu1 %vm98_vm1, %v90_v27 }
  0xe2   :  { %v91_v28 = vpop.trf.xlu0 }
  0xe3   :  { %568 = vmatmul.mubr.msk.f32.gmra.mxu1 %vm98_vm1, %v91_v28 }
  0xe6   :  { %v92_v29 = vpop.trf.xlu0 }
  0xe7   :  { %570 = vmatprep.mubr.msk.f32.mxu1 %vm98_vm1, %v92_v29 }
  0xea   :  { %v93_v30 = vpop.trf.xlu0 }
  0xeb   :  { %571 = vmatmul.mubr.msk.f32.gmra.mxu1 %vm98_vm1, %v93_v30 }
  0xee   :  { %v94_v31 = vpop.trf.xlu0 }
  0xef   :  { %573 = vmatprep.mubr.msk.f32.mxu1 %vm98_vm1, %v94_v31 }
  0xf2   :  { %v95_v32 = vpop.trf.xlu0 }
  0xf3   :  { %574 = vmatmul.mubr.msk.f32.gmra.mxu1 %vm98_vm1, %v95_v32 }
  0xf6   :  { %v96_v33 = vpop.trf.xlu0 }
  0xf7   :  { %576 = vmatprep.mubr.msk.f32.mxu1 %vm98_vm1, %v96_v33 }
  0xfa   :  { %v97_v34 = vpop.trf.xlu0 }
  0xfb   :  { %577 = vmatmul.mubr.msk.f32.gmra.mxu1 %vm98_vm1, %v97_v34 }
 0x143   :  { %v533_v36 = vpop.f32.mrf.mxu0 }
 0x144   :  { %v271_v37 = vadd.f32 %v533_v36, %v643_v35 }
 0x145   :  { %v265_v38 = vpop.f32.mrf.mxu0 }
 0x146   :  { %426 = vst.msk [vmem:[%s808_s3 + $0x8] sm:$0xff] %vm424_vm2, %v271_v37  ;;  %v266_v39 = vadd.f32 %v643_v35, %v265_v38 }
 0x148   :  { %425 = vst.msk [vmem:[%s808_s3] sm:$0xff] %vm424_vm2, %v266_v39 }
 0x14b   :  { %v536_v40 = vpop.f32.mrf.mxu0 }
 0x14c   :  { %v281_v41 = vadd.f32 %v536_v40, %v643_v35 }
 0x14d   :  { %v275_v42 = vpop.f32.mrf.mxu0 }
 0x14e   :  { %428 = vst.msk [vmem:[%s808_s3 + $0x18] sm:$0xff] %vm424_vm2, %v281_v41  ;;  %v276_v43 = vadd.f32 %v643_v35, %v275_v42 }
 0x150   :  { %427 = vst.msk [vmem:[%s808_s3 + $0x10] sm:$0xff] %vm424_vm2, %v276_v43 }
 0x153   :  { %v539_v44 = vpop.f32.mrf.mxu0 }
 0x154   :  { %v291_v45 = vadd.f32 %v539_v44, %v643_v35 }
 0x155   :  { %v285_v46 = vpop.f32.mrf.mxu0 }
 0x156   :  { %430 = vst.msk [vmem:[%s808_s3 + $0x28] sm:$0xff] %vm424_vm2, %v291_v45  ;;  %v286_v47 = vadd.f32 %v643_v35, %v285_v46 }
 0x158   :  { %429 = vst.msk [vmem:[%s808_s3 + $0x20] sm:$0xff] %vm424_vm2, %v286_v47 }
 0x15b   :  { %v542_v48 = vpop.f32.mrf.mxu0 }
 0x15c   :  { %v301_v49 = vadd.f32 %v542_v48, %v643_v35 }
 0x15d   :  { %v295_v50 = vpop.f32.mrf.mxu0 }
 0x15e   :  { %432 = vst.msk [vmem:[%s808_s3 + $0x38] sm:$0xff] %vm424_vm2, %v301_v49  ;;  %v296_v51 = vadd.f32 %v643_v35, %v295_v50 }
 0x160   :  { %431 = vst.msk [vmem:[%s808_s3 + $0x30] sm:$0xff] %vm424_vm2, %v296_v51 }
 0x163   :  { %v545_v52 = vpop.f32.mrf.mxu0 }
 0x164   :  { %v311_v53 = vadd.f32 %v545_v52, %v643_v35 }
 0x165   :  { %v305_v54 = vpop.f32.mrf.mxu0 }
 0x166   :  { %434 = vst.msk [vmem:[%s808_s3 + $0x48] sm:$0xff] %vm424_vm2, %v311_v53  ;;  %v306_v55 = vadd.f32 %v643_v35, %v305_v54 }
 0x168   :  { %433 = vst.msk [vmem:[%s808_s3 + $0x40] sm:$0xff] %vm424_vm2, %v306_v55 }
 0x16b   :  { %v548_v56 = vpop.f32.mrf.mxu0 }
 0x16c   :  { %v321_v57 = vadd.f32 %v548_v56, %v643_v35 }
 0x16d   :  { %v315_v58 = vpop.f32.mrf.mxu0 }
 0x16e   :  { %436 = vst.msk [vmem:[%s808_s3 + $0x58] sm:$0xff] %vm424_vm2, %v321_v57  ;;  %v316_v59 = vadd.f32 %v643_v35, %v315_v58 }
 0x170   :  { %435 = vst.msk [vmem:[%s808_s3 + $0x50] sm:$0xff] %vm424_vm2, %v316_v59 }
 0x173   :  { %v551_v60 = vpop.f32.mrf.mxu0 }
 0x174   :  { %v331_v61 = vadd.f32 %v551_v60, %v643_v35 }
 0x175   :  { %v325_v62 = vpop.f32.mrf.mxu0 }
 0x176   :  { %438 = vst.msk [vmem:[%s808_s3 + $0x68] sm:$0xff] %vm424_vm2, %v331_v61  ;;  %v326_v63 = vadd.f32 %v643_v35, %v325_v62 }
 0x178   :  { %437 = vst.msk [vmem:[%s808_s3 + $0x60] sm:$0xff] %vm424_vm2, %v326_v63 }
 0x17b   :  { %v554_v0 = vpop.f32.mrf.mxu0 }
 0x17c   :  { %v341_v1 = vadd.f32 %v554_v0, %v643_v35 }
 0x17d   :  { %v335_v2 = vpop.f32.mrf.mxu0 }
 0x17e   :  { %440 = vst.msk [vmem:[%s808_s3 + $0x78] sm:$0xff] %vm424_vm2, %v341_v1  ;;  %v336_v3 = vadd.f32 %v643_v35, %v335_v2 }
 0x180   :  { %439 = vst.msk [vmem:[%s808_s3 + $0x70] sm:$0xff] %vm424_vm2, %v336_v3 }
 0x183   :  { %v557_v4 = vpop.f32.mrf.mxu1 }
 0x184   :  { %v351_v5 = vadd.f32 %v557_v4, %v643_v35 }
 0x185   :  { %v345_v6 = vpop.f32.mrf.mxu1 }
 0x186   :  { %442 = vst.msk [vmem:[%s808_s3 + $0x88] sm:$0xff] %vm424_vm2, %v351_v5  ;;  %v346_v7 = vadd.f32 %v643_v35, %v345_v6 }
 0x188   :  { %441 = vst.msk [vmem:[%s808_s3 + $0x80] sm:$0xff] %vm424_vm2, %v346_v7 }
 0x18b   :  { %v560_v8 = vpop.f32.mrf.mxu1 }
 0x18c   :  { %v361_v9 = vadd.f32 %v560_v8, %v643_v35 }
 0x18d   :  { %v355_v10 = vpop.f32.mrf.mxu1 }
 0x18e   :  { %444 = vst.msk [vmem:[%s808_s3 + $0x98] sm:$0xff] %vm424_vm2, %v361_v9  ;;  %v356_v11 = vadd.f32 %v643_v35, %v355_v10 }
 0x190   :  { %443 = vst.msk [vmem:[%s808_s3 + $0x90] sm:$0xff] %vm424_vm2, %v356_v11 }
 0x193   :  { %v563_v12 = vpop.f32.mrf.mxu1 }
 0x194   :  { %v371_v13 = vadd.f32 %v563_v12, %v643_v35 }
 0x195   :  { %v365_v14 = vpop.f32.mrf.mxu1 }
 0x196   :  { %446 = vst.msk [vmem:[%s808_s3 + $0xa8] sm:$0xff] %vm424_vm2, %v371_v13  ;;  %v366_v15 = vadd.f32 %v643_v35, %v365_v14 }
 0x198   :  { %445 = vst.msk [vmem:[%s808_s3 + $0xa0] sm:$0xff] %vm424_vm2, %v366_v15 }
 0x19b   :  { %v566_v16 = vpop.f32.mrf.mxu1 }
 0x19c   :  { %v381_v17 = vadd.f32 %v566_v16, %v643_v35 }
 0x19d   :  { %v375_v18 = vpop.f32.mrf.mxu1 }
 0x19e   :  { %448 = vst.msk [vmem:[%s808_s3 + $0xb8] sm:$0xff] %vm424_vm2, %v381_v17  ;;  %v376_v19 = vadd.f32 %v643_v35, %v375_v18 }
 0x1a0   :  { %447 = vst.msk [vmem:[%s808_s3 + $0xb0] sm:$0xff] %vm424_vm2, %v376_v19 }
 0x1a3   :  { %v569_v20 = vpop.f32.mrf.mxu1 }
 0x1a4   :  { %v391_v21 = vadd.f32 %v569_v20, %v643_v35 }
 0x1a5   :  { %v385_v22 = vpop.f32.mrf.mxu1 }
 0x1a6   :  { %450 = vst.msk [vmem:[%s808_s3 + $0xc8] sm:$0xff] %vm424_vm2, %v391_v21  ;;  %v386_v23 = vadd.f32 %v643_v35, %v385_v22 }
 0x1a8   :  { %449 = vst.msk [vmem:[%s808_s3 + $0xc0] sm:$0xff] %vm424_vm2, %v386_v23 }
 0x1ab   :  { %v572_v24 = vpop.f32.mrf.mxu1 }
 0x1ac   :  { %v401_v25 = vadd.f32 %v572_v24, %v643_v35 }
 0x1ad   :  { %v395_v26 = vpop.f32.mrf.mxu1 }
 0x1ae   :  { %452 = vst.msk [vmem:[%s808_s3 + $0xd8] sm:$0xff] %vm424_vm2, %v401_v25  ;;  %v396_v27 = vadd.f32 %v643_v35, %v395_v26 }
 0x1b0   :  { %451 = vst.msk [vmem:[%s808_s3 + $0xd0] sm:$0xff] %vm424_vm2, %v396_v27 }
 0x1b3   :  { %v575_v28 = vpop.f32.mrf.mxu1 }
 0x1b4   :  { %v411_v29 = vadd.f32 %v575_v28, %v643_v35 }
 0x1b5   :  { %v405_v30 = vpop.f32.mrf.mxu1 }
 0x1b6   :  { %454 = vst.msk [vmem:[%s808_s3 + $0xe8] sm:$0xff] %vm424_vm2, %v411_v29  ;;  %v406_v31 = vadd.f32 %v643_v35, %v405_v30 }
 0x1b8   :  { %453 = vst.msk [vmem:[%s808_s3 + $0xe0] sm:$0xff] %vm424_vm2, %v406_v31 }
 0x1bb   :  { %v578_v32 = vpop.f32.mrf.mxu1 }
 0x1bc   :  { %v421_v33 = vadd.f32 %v578_v32, %v643_v35 }
 0x1bd   :  { %v415_v34 = vpop.f32.mrf.mxu1 }
 0x1be   :  { %456 = vst.msk [vmem:[%s808_s3 + $0xf8] sm:$0xff] %vm424_vm2, %v421_v33  ;;  %v416_v36 = vadd.f32 %v643_v35, %v415_v34 }
 0x1c0   :  { %455 = vst.msk [vmem:[%s808_s3 + $0xf0] sm:$0xff] %vm424_vm2, %v416_v36 }

</bundles_post_ra>
